<compile_context>
chip_gen: v7x
topology: tpu7x:2x2x1
jax: 0.10.0
libtpu: 0.0.40
codegen_flags: <defaults>
</compile_context>

<pallas_src>
import jax
import jax.numpy as jnp
import numpy as np
from jax.experimental import pallas as pl
from jax.experimental.pallas import tpu as pltpu  # noqa: F401  (TPU backend)

# ---------------- problem sizes ----------------------------------------------
B = 2        # batch
S = 8        # sequence length
D = 32       # c_model (LayerNorm feature dim)
H = 4        # attention heads
DH = D // H  # head dim
DFF = 64     # position-wise hidden dim
EPS = 1e-6
N = B * S    # flattened token count


def _layer_norm(v, a, b):
    """Spec LayerNorm: a * (v - mean) / (std_unbiased + eps) + b."""
    mean = jnp.mean(v, axis=-1, keepdims=True)
    var = jnp.sum((v - mean) ** 2, axis=-1, keepdims=True) * (1.0 / (D - 1))
    std = jnp.sqrt(var)
    return a * (v - mean) * pl.reciprocal(std + EPS, approx=False) + b


# ---------------- kernel 1: the spec module (LayerNorm) ----------------------
def layer_norm_kernel(x_ref, a_ref, b_ref, out_ref):
    out_ref[...] = _layer_norm(x_ref[...], a_ref[...], b_ref[...]).astype(out_ref.dtype)


def layer_norm_pallas(x, a, b):
    # single invocation, no grid: whole (B*S, D) slab lives in VMEM.
    x2 = x.reshape(-1, D)
    out = pl.pallas_call(
        layer_norm_kernel,
        out_shape=jax.ShapeDtypeStruct(x2.shape, jnp.float32),
    )(x2, a, b)
    return out.reshape(x.shape)


# ---------------- kernel 2: fused pre-LN encoder block ------------------------
def encoder_layer_kernel(x_ref, bias_ref,
                         la1_ref, lb1_ref,
                         wqkv_ref, bqkv_ref, wo_ref, bo_ref,
                         la2_ref, lb2_ref,
                         w1_ref, b1_ref, w2_ref, b2_ref,
                         out_ref):
    x = x_ref[...]          # (N, D)   flattened (B*S) tokens
    bias = bias_ref[...]    # (N, N)   additive attention bias (0 / -1e9)

    # ---- sublayer 0: x + attention(norm(x), mask) ----
    xn = _layer_norm(x, la1_ref[...], lb1_ref[...])                    # (N, D)

    # fused, head-batched Q/K/V projection: one einsum instead of 3 matmuls
    # + a per-head loop.  wqkv is (H, D, 3*DH), bqkv is (H, 1, 3*DH).
    xn_h = jnp.broadcast_to(xn, (H, N, D))                             # (H, N, D)
    qkv = jnp.einsum("hnd,hdf->hnf", xn_h, wqkv_ref[...],
                     preferred_element_type=jnp.float32) + bqkv_ref[...]   # (H, N, 3DH)
    q = qkv[:, :, 0:DH]
    k = qkv[:, :, DH:2 * DH]
    v = qkv[:, :, 2 * DH:3 * DH]

    scale = 1.0 / jnp.sqrt(jnp.float32(DH))
    s = jnp.einsum("hqd,hkd->hqk", q, k,
                   preferred_element_type=jnp.float32) * scale         # (H, N, N)
    s = s + bias[None, :, :]                                           # mask hoisted
    s = s - jnp.max(s, axis=-1, keepdims=True)                         # stable softmax
    p = jnp.exp(s)
    p = p * pl.reciprocal(jnp.sum(p, axis=-1, keepdims=True), approx=False)

    ctx = jnp.einsum("hqk,hkd->hqd", p, v,
                     preferred_element_type=jnp.float32)               # (H, N, DH)
    # head merge + output projection without any lane concatenate:
    # sum_h ctx_h @ Wo[h]  ==  concat(ctx_h) @ Wo
    o_h = jnp.einsum("hnd,hdc->hnc", ctx, wo_ref[...],
                     preferred_element_type=jnp.float32)               # (H, N, D)
    attn = jnp.sum(o_h, axis=0) + bo_ref[...]                          # (N, D)
    x1 = x + attn        # dropout is identity in eval mode

    # ---- sublayer 1: x + pos_wise(norm(x)) ----
    xn2 = _layer_norm(x1, la2_ref[...], lb2_ref[...])
    hid = jnp.maximum(
        jnp.dot(xn2, w1_ref[...], preferred_element_type=jnp.float32) + b1_ref[...], 0.0)
    ff = jnp.dot(hid, w2_ref[...], preferred_element_type=jnp.float32) + b2_ref[...]

    out_ref[...] = (x1 + ff).astype(out_ref.dtype)


def encoder_layer(x, mask, params):
    (la1, lb1, wq, bq, wk, bk, wv, bv, wo, bo, la2, lb2, w1, b1, w2, b2) = params

    # ---- wrapper-side layout plumbing (plain XLA, outside the kernel) ----
    x2 = x.reshape(N, D)

    # additive attention bias, (N, N): block-diagonal over the batch so the
    # flattened B*S sequence never attends across batch elements; within a
    # batch, mask==0 positions get -1e9.
    block = jnp.where(mask.reshape(B, S, S) == 0, jnp.float32(-1e9), jnp.float32(0.0))
    eye = jnp.eye(B, dtype=jnp.float32)[:, None, :, None]              # (B,1,B,1)
    attn_bias = (eye * block[:, :, None, :]
                 + (1.0 - eye) * jnp.float32(-1e9)).reshape(N, N)

    # fused head-major Q/K/V weight (H, D, 3*DH) and bias (H, 1, 3*DH)
    wqkv = jnp.concatenate(
        [wq.reshape(D, H, DH), wk.reshape(D, H, DH), wv.reshape(D, H, DH)],
        axis=-1).transpose(1, 0, 2)
    bqkv = jnp.concatenate(
        [bq.reshape(H, DH), bk.reshape(H, DH), bv.reshape(H, DH)],
        axis=-1).reshape(H, 1, 3 * DH)
    wo3 = wo.reshape(H, DH, D)                                         # head-major out proj

    # single kernel invocation: no grid, every operand is one whole-array VMEM block.
    out2 = pl.pallas_call(
        encoder_layer_kernel,
        out_shape=jax.ShapeDtypeStruct((N, D), jnp.float32),
    )(x2, attn_bias, la1, lb1, wqkv, bqkv, wo3, bo, la2, lb2, w1, b1, w2, b2)
    return out2.reshape(B, S, D)


# ---------------- pure-JAX references -----------------------------------------
def layer_norm_ref(x, a, b):
    mean = jnp.mean(x, axis=-1, keepdims=True)
    var = jnp.sum((x - mean) ** 2, axis=-1, keepdims=True) / (D - 1)
    return a * (x - mean) / (jnp.sqrt(var) + EPS) + b


def encoder_layer_ref(x, mask, params):
    (la1, lb1, wq, bq, wk, bk, wv, bv, wo, bo, la2, lb2, w1, b1, w2, b2) = params
    mask2 = mask.reshape(B, 1, S, S)

    xn = layer_norm_ref(x, la1, lb1)
    q = xn @ wq + bq
    k = xn @ wk + bk
    v = xn @ wv + bv
    qh = q.reshape(B, S, H, DH).transpose(0, 2, 1, 3)
    kh = k.reshape(B, S, H, DH).transpose(0, 2, 1, 3)
    vh = v.reshape(B, S, H, DH).transpose(0, 2, 1, 3)
    scores = jnp.einsum("bhqd,bhkd->bhqk", qh, kh) / jnp.sqrt(jnp.float32(DH))
    scores = jnp.where(mask2 == 0, -1e9, scores)
    p = jax.nn.softmax(scores, axis=-1)
    ctx = jnp.einsum("bhqk,bhkd->bhqd", p, vh).transpose(0, 2, 1, 3).reshape(B, S, D)
    x1 = x + (ctx @ wo + bo)

    xn2 = layer_norm_ref(x1, la2, lb2)
    ff = jnp.maximum(xn2 @ w1 + b1, 0.0) @ w2 + b2
    return x1 + ff


# ---------------- deterministic parameter init --------------------------------
def init_params(key):
    ks = jax.random.split(key, 8)
    scale = 0.1
    la1 = jnp.ones((1, D), jnp.float32)
    lb1 = jnp.zeros((1, D), jnp.float32)
    wq = scale * jax.random.normal(ks[0], (D, D), jnp.float32)
    wk = scale * jax.random.normal(ks[1], (D, D), jnp.float32)
    wv = scale * jax.random.normal(ks[2], (D, D), jnp.float32)
    wo = scale * jax.random.normal(ks[3], (D, D), jnp.float32)
    bq = scale * jax.random.normal(ks[4], (1, D), jnp.float32)
    bk = jnp.zeros((1, D), jnp.float32)
    bv = jnp.zeros((1, D), jnp.float32)
    bo = scale * jax.random.normal(ks[5], (1, D), jnp.float32)
    la2 = jnp.ones((1, D), jnp.float32)
    lb2 = jnp.zeros((1, D), jnp.float32)
    w1 = scale * jax.random.normal(ks[6], (D, DFF), jnp.float32)
    b1 = jnp.zeros((1, DFF), jnp.float32)
    w2 = scale * jax.random.normal(ks[7], (DFF, D), jnp.float32)
    b2 = jnp.zeros((1, D), jnp.float32)
    return (la1, lb1, wq, bq, wk, bk, wv, bv, wo, bo, la2, lb2, w1, b1, w2, b2)


if __name__ == "__main__":
    key = jax.random.PRNGKey(0)
    kx, kp = jax.random.split(key)
    x = jax.random.normal(kx, (B, S, D), jnp.float32)
    mask = jnp.ones((B, 1, S, S), jnp.float32)   # all positions valid
    params = init_params(kp)

    # 1) the spec module itself: LayerNorm as a Pallas kernel
    ln_fn = jax.jit(layer_norm_pallas)
    ln_out = jax.block_until_ready(ln_fn(x, params[0], params[1]))
    np.testing.assert_allclose(np.asarray(ln_out),
                               np.asarray(layer_norm_ref(x, params[0], params[1])),
                               rtol=1e-4, atol=1e-4)

    # 2) the fused pre-LN encoder block built around it
    enc_fn = jax.jit(encoder_layer)
    out = jax.block_until_ready(enc_fn(x, mask, params))
    np.testing.assert_allclose(np.asarray(out),
                               np.asarray(encoder_layer_ref(x, mask, params)),
                               rtol=1e-4, atol=1e-4)

    print("KERNEL_OK")
</pallas_src>

<mosaic_0001>
module attributes {stable_mosaic.version = 11 : i64} {
  func.func @layer_norm_kernel(%arg0: memref<16x32xf32, #tpu.memory_space<vmem>>, %arg1: memref<1x32xf32, #tpu.memory_space<vmem>>, %arg2: memref<1x32xf32, #tpu.memory_space<vmem>>, %arg3: memref<16x32xf32, #tpu.memory_space<vmem>>) attributes {dimension_semantics = [], scalar_prefetch = 0 : i64, scratch_operands = 0 : i64, tpu.core_type = #tpu.core_type<tc>} {
    %c0 = arith.constant 0 : index
    %c0_0 = arith.constant 0 : index
    %0 = vector.load %arg0[%c0, %c0_0] : memref<16x32xf32, #tpu.memory_space<vmem>>, vector<16x32xf32>
    %c0_1 = arith.constant 0 : index
    %c0_2 = arith.constant 0 : index
    %1 = vector.load %arg1[%c0_1, %c0_2] : memref<1x32xf32, #tpu.memory_space<vmem>>, vector<1x32xf32>
    %c0_3 = arith.constant 0 : index
    %c0_4 = arith.constant 0 : index
    %2 = vector.load %arg2[%c0_3, %c0_4] : memref<1x32xf32, #tpu.memory_space<vmem>>, vector<1x32xf32>
    %cst = arith.constant dense<0.000000e+00> : vector<16xf32>
    %3 = vector.multi_reduction <add>, %0, %cst [1] : vector<16x32xf32> to vector<16xf32>
    %4 = vector.shape_cast %3 : vector<16xf32> to vector<16x1xf32>
    %cst_5 = arith.constant 3.200000e+01 : f32
    %5 = vector.broadcast %cst_5 : f32 to vector<16x1xf32>
    %6 = arith.divf %4, %5 : vector<16x1xf32>
    %7 = vector.broadcast %6 : vector<16x1xf32> to vector<16x32xf32>
    %8 = arith.subf %0, %7 : vector<16x32xf32>
    %9 = arith.mulf %8, %8 : vector<16x32xf32>
    %cst_6 = arith.constant dense<0.000000e+00> : vector<16xf32>
    %10 = vector.multi_reduction <add>, %9, %cst_6 [1] : vector<16x32xf32> to vector<16xf32>
    %11 = vector.shape_cast %10 : vector<16xf32> to vector<16x1xf32>
    %cst_7 = arith.constant 0.0322580636 : f32
    %12 = vector.broadcast %cst_7 : f32 to vector<16x1xf32>
    %13 = arith.mulf %11, %12 : vector<16x1xf32>
    %14 = math.sqrt %13 : vector<16x1xf32>
    %15 = vector.broadcast %6 : vector<16x1xf32> to vector<16x32xf32>
    %16 = arith.subf %0, %15 : vector<16x32xf32>
    %17 = vector.broadcast %1 : vector<1x32xf32> to vector<16x32xf32>
    %18 = arith.mulf %17, %16 : vector<16x32xf32>
    %cst_8 = arith.constant 9.99999997E-7 : f32
    %19 = vector.broadcast %cst_8 : f32 to vector<16x1xf32>
    %20 = arith.addf %14, %19 : vector<16x1xf32>
    %21 = tpu.reciprocal %20 : vector<16x1xf32> -> vector<16x1xf32>
    %22 = vector.broadcast %21 : vector<16x1xf32> to vector<16x32xf32>
    %23 = arith.mulf %18, %22 : vector<16x32xf32>
    %24 = vector.broadcast %2 : vector<1x32xf32> to vector<16x32xf32>
    %25 = arith.addf %23, %24 : vector<16x32xf32>
    %c0_9 = arith.constant 0 : index
    %c0_10 = arith.constant 0 : index
    %26 = vector.load %arg3[%c0_9, %c0_10] : memref<16x32xf32, #tpu.memory_space<vmem>>, vector<16x32xf32>
    tpu.vector_store %arg3[%c0_9, %c0_10], %25 {strides = array<i32>} : memref<16x32xf32, #tpu.memory_space<vmem>>, vector<16x32xf32>,
    return
  }
}

</mosaic_0001>

<bundles_post_ra>
// kernel: layer_norm_pallas.1
= control target key start
LH: loop header
LB: loop body
LE: loop exit
PB: predicated region body
PF: predicated region fallthrough
CT: control target
= control target key end

     0   :  { %8 = vsyncpa [#allocation3], 0  ;;  %s238_s0 = inlined_call_operand.hbm [shape: f32[16,32], index: 0, kind: input, shape index: {}]   ;;  %s239_s1 = inlined_call_operand.vmem [shape: f32[1,32], index: 1, kind: input, shape index: {}]   ;;  %s240_s2 = inlined_call_operand.vmem [shape: f32[1,32], index: 2, kind: input, shape index: {}]   ;;  %s241_s3 = inlined_call_operand.hbm [shape: f32[16,32], index: 3, kind: output, shape index: {}]  }
   0x1   :  { %9 = vsyncpa [#allocation4], 0  ;;  %s172_s12 = smov [#allocation2]   ;;  %s124_s16 = scalar_lea.hbm %s238_s0, 256 }
   0x2   :  { %s15_s13 = sshll.u32 %s172_s12, 4  ;;  %p125_p0 = scmp.ne.s32.totalorder %s238_s0, %s124_s16  ;;  %s16_s13 = int_to_ptr.vmem [resolvable:$true] %s15_s13 }
   0x3   :  { %p128_p1 = scmp.lt.u32.totalorder %s124_s16, %s238_s0 }
   0x5   :  { %p130_p2 = pnand %p128_p1, %p125_p0 }
   0x7   :  { %133 = shalt.err (!%p130_p2)
}
   0x8   :  { %s134_s21 = scalar_lea.vmem %s16_s13, 256  ;;  %p139_p4 = scmp.lt.s32.totalorder %s16_s13, %s16_s13 }
   0x9   :  { %p135_p3 = scmp.ne.s32.totalorder %s16_s13, %s134_s21  ;;  %p140_p5 = scmp.lt.s32.totalorder %s134_s21, %s134_s21 }
   0xb   :  { %p141_p6 = por %p140_p5, %p139_p4 }
   0xd   :  { %p142_p7 = pnand %p141_p6, %p135_p3 }
   0xf   :  { %145 = shalt.err (!%p142_p7)
}
  0x10   :  { %s173_s22 = smov 128   ;;  %s174_s23 = smov 8  }
  0x11   :  { %21 = dma.hbm_to_vmem [thread:$0]  %s238_s0, 256, %s16_s13, [#allocation3], %s173_s22, %s173_s22, %s174_s23  }
  0x12   :  { %168 = dma.done.wait [#allocation3], 256  }
  0x13   :  { %169 = vsyncadd [#allocation3], 4294967040  ;;  %vm33_vm0 = vcmask 261120   ;;  %v29_v0 = vld [vmem:[#allocation2] sm:$0xff]  ;;  %v30_v1 = vld [vmem:[#allocation2 + $0x8] sm:$0xff]  ;;  %s175_s29 = smov [#allocation5]  }
  0x14   :  { %v34_v2 = vsel %vm33_vm0, %v29_v0, 0.0  ;;  %v37_v3 = vsel %vm33_vm0, %v30_v1, 0.0  ;;  %v110_v30 = vld [vmem:[%s239_s1] ss:$0 sm:$0xff]  ;;  %s98_s30 = sshll.u32 %s175_s29, 4  ;;  %s99_s30 = int_to_ptr.vmem [resolvable:$true] %s98_s30 }
  0x15   :  { %35 = vadd.xlane.f32.xlu0 %v34_v2  ;;  %v111_v33 = vld [vmem:[%s240_s2] ss:$0 sm:$0xff]  ;;  %s146_s1 = scalar_lea.vmem %s99_s30, 256  ;;  %p151_p9 = scmp.lt.s32.totalorder %s99_s30, %s99_s30 }
  0x16   :  { %p147_p8 = scmp.ne.s32.totalorder %s99_s30, %s146_s1  ;;  %p152_p10 = scmp.lt.s32.totalorder %s146_s1, %s146_s1 }
  0x18   :  { %p153_p11 = por %p152_p10, %p151_p9 }
  0x19   :  { %38 = vadd.xlane.f32.xlu0 %v37_v3 }
  0x1a   :  { %p154_p12 = pnand %p153_p11, %p147_p8 }
  0xa2   :  { %v36_v4 = vpop.xlane.xlu0 %35 }
  0xa3   :  { %v41_v5 = vmul.f32 0.03125, %v36_v4 }
  0xa5   :  { %v43_v6 = vsub.f32 %v29_v0, %v41_v5 }
  0xa6   :  { %v39_v7 = vpop.xlane.xlu0 %38 }
  0xa7   :  { %v42_v8 = vmul.f32 0.03125, %v39_v7  ;;  %v45_v9 = vmul.f32 %v43_v6, %v43_v6  ;;  %v75_v31 = vmul.f32 %v110_v30, %v43_v6 }
  0xa9   :  { %v44_v10 = vsub.f32 %v30_v1, %v42_v8  ;;  %v47_v11 = vsel %vm33_vm0, %v45_v9, 0.0 }
  0xaa   :  { %48 = vadd.xlane.f32.xlu1 %v47_v11 }
  0xab   :  { %v46_v12 = vmul.f32 %v44_v10, %v44_v10  ;;  %v76_v35 = vmul.f32 %v110_v30, %v44_v10 }
  0xad   :  { %v50_v13 = vsel %vm33_vm0, %v46_v12, 0.0 }
  0xae   :  { %51 = vadd.xlane.f32.xlu1 %v50_v13 }
 0x137   :  { %v49_v14 = vpop.xlane.xlu1 %48 }
 0x138   :  { %v53_v15 = vmul.f32 0.032258064, %v49_v14 }
 0x13a   :  { %116 = vrsqrt.f32 %v53_v15  ;;  %vm57_vm1 = vcmp.eq.f32.partialorder %v53_v15, inf  ;;  %v60_v20 = vand.u32 2147483648, %v53_v15  ;;  %vm59_vm2 = vcmp.eq.f32.partialorder %v53_v15, 0.0 }
 0x13b   :  { %v52_v16 = vpop.xlane.xlu1 %51 }
 0x13c   :  { %v54_v17 = vmul.f32 0.032258064, %v52_v16 }
 0x13e   :  { %118 = vrsqrt.f32 %v54_v17  ;;  %vm64_vm3 = vcmp.eq.f32.partialorder %v54_v17, inf  ;;  %v67_v26 = vand.u32 2147483648, %v54_v17  ;;  %vm66_vm4 = vcmp.eq.f32.partialorder %v54_v17, 0.0 }
 0x144   :  { %v117_v18 = vpop.eup %116 }
 0x145   :  { %v56_v19 = vmul.f32 %v117_v18, %v53_v15 }
 0x147   :  { %v58_v21 = vsel %vm57_vm1, %v53_v15, %v56_v19 }
 0x148   :  { %v119_v22 = vpop.eup %118  ;;  %v61_v23 = vsel %vm59_vm2, %v60_v20, %v58_v21 }
 0x149   :  { %v77_v24 = vadd.f32 1e-06, %v61_v23  ;;  %v63_v25 = vmul.f32 %v119_v22, %v54_v17 }
 0x14b   :  { %v65_v27 = vsel %vm64_vm3, %v54_v17, %v63_v25  ;;  %120 = vrcp.f32 %v77_v24 }
 0x14c   :  { %v68_v28 = vsel %vm66_vm4, %v67_v26, %v65_v27 }
 0x14d   :  { %v78_v29 = vadd.f32 1e-06, %v68_v28 }
 0x14f   :  { %122 = vrcp.f32 %v78_v29 }
 0x155   :  { %v121_v32 = vpop.eup %120 }
 0x156   :  { %v81_v34 = vmul.f32 %v121_v32, %v75_v31 }
 0x158   :  { %v89_v36 = vadd.f32 %v111_v33, %v81_v34 }
 0x159   :  { %v123_v37 = vpop.eup %122 }
 0x15a   :  { %v82_v38 = vmul.f32 %v123_v37, %v76_v35  ;;  %91 = vst.msk [vmem:[#allocation5] sm:$0xff] %vm33_vm0, %v89_v36 }
 0x15c   :  { %v90_v39 = vadd.f32 %v111_v33, %v82_v38 }
 0x15e   :  { %92 = vst.msk [vmem:[#allocation5 + $0x8] sm:$0xff] %vm33_vm0, %v90_v39 }
 0x15f   :  { %157 = shalt.err (!%p154_p12)
}
 0x160   :  { %s158_s5 = scalar_lea.hbm %s241_s3, 256 }
 0x161   :  { %p159_p13 = scmp.ne.s32.totalorder %s241_s3, %s158_s5  ;;  %p162_p0 = scmp.lt.u32.totalorder %s158_s5, %s241_s3 }
 0x163   :  { %p164_p1 = pnand %p162_p0, %p159_p13 }
 0x165   :  { %167 = shalt.err (!%p164_p1)
}
 0x166   :  { %104 = dma.vmem_to_hbm [thread:$0]  %s99_s30, 256, %s241_s3, [#allocation4], %s173_s22, %s173_s22, %s174_s23  }
 0x167   :  { %170 = dma.done.wait [#allocation4], 256  }
 0x168   :  { %171 = vsyncadd [#allocation4], 4294967040 }
 0x169   :  { %108 = vsyncpa [#allocation3], 1 }
 0x16a   :  { %109 = vsyncpa [#allocation4], 1 }

</bundles_post_ra>
